<compile_context>
chip_gen: v7x
topology: tpu7x:2x2x1
jax: 0.10.0
libtpu: 0.0.40
codegen_flags: <defaults>
</compile_context>

<pallas_src>
import jax
import jax.numpy as jnp
from jax.experimental import pallas as pl
from jax.experimental.pallas import tpu as pltpu

_MIB = 1024 * 1024


def _chunk_layout(dim, split_size):
    """torch.split semantics for an int split_size: equal chunks, last may be smaller."""
    out = []
    start = 0
    while start < dim:
        size = min(split_size, dim - start)
        out.append((start, size))
        start += size
    return out


def _vmem_capacity_bytes():
    """Physical VMEM on this chip (fallback: assume the smaller 64 MiB parts)."""
    try:
        return int(pltpu.get_tpu_info().vmem_capacity_bytes)
    except Exception:
        return 64 * _MIB


def _make_dma_split_kernel(axis, boundaries, ndim, n_out):
    """Pure HBM->HBM copy: one async DMA per output chunk."""
    def kernel(x_hbm, *rest):
        out_refs = rest[:n_out]
        sem = rest[n_out]
        copies = []
        for i, ((start, size), o_ref) in enumerate(zip(boundaries, out_refs)):
            idx = tuple(
                slice(start, start + size) if d == axis else slice(None)
                for d in range(ndim)
            )
            cp = pltpu.make_async_copy(x_hbm.at[idx], o_ref, sem.at[i])
            cp.start()
            copies.append(cp)
        for cp in copies:
            cp.wait()
    return kernel


def _make_copy_split_kernel(axis, boundaries, ndim):
    """Per-chunk ref->ref copies inside a VMEM block (streaming vld/vst)."""
    def kernel(x_ref, *out_refs):
        for (start, size), o_ref in zip(boundaries, out_refs):
            idx = tuple(
                slice(start, start + size) if d == axis else slice(None)
                for d in range(ndim)
            )
            o_ref[...] = x_ref[idx]
    return kernel


def _choose_grid_axis(shape, axis, itemsize):
    """Pick the grid axis (and its block alignment) for the tiled copy path.

    Prefers the largest eligible leading (non-split, non-trailing-two) axis;
    falls back to tiling the non-split trailing dim when leading axes are tiny.
    """
    ndim = len(shape)
    lead = [d for d in range(max(0, ndim - 2)) if d != axis]
    best = max(lead, key=lambda d: shape[d]) if lead else None
    if best is not None and shape[best] >= 8:
        return best, 1
    trailing = [d for d in range(max(0, ndim - 2), ndim) if d != axis]
    for t in sorted(trailing, key=lambda d: -shape[d]):
        align = 128 if t == ndim - 1 else max(8, 32 // max(1, itemsize))
        if shape[t] >= 2 * align:
            return t, align
    if best is not None:
        return best, 1
    return None, None


def _split_grid_path(x, axis, out_shapes, kernel, vmem_limit,
                     target_block_bytes, cost):
    ndim = x.ndim
    itemsize = jnp.dtype(x.dtype).itemsize
    g, align = _choose_grid_axis(x.shape, axis, itemsize)

    if g is None:
        # Low-rank fallback: whole array as a single block (last-two dims
        # equal the full dims, so the (8,128) rule is satisfied).
        return pl.pallas_call(
            kernel,
            out_shape=tuple(out_shapes),
            in_specs=[pl.BlockSpec(memory_space=pltpu.MemorySpace.VMEM)],
            out_specs=tuple(
                pl.BlockSpec(memory_space=pltpu.MemorySpace.VMEM)
                for _ in out_shapes
            ),
            compiler_params=pltpu.CompilerParams(vmem_limit_bytes=vmem_limit),
            cost_estimate=cost,
        )(x)

    # Bytes of input per unit length of the grid axis.
    row_bytes = itemsize
    for d, s in enumerate(x.shape):
        if d != g:
            row_bytes *= s

    dim_g = x.shape[g]
    bg = max(align, min(dim_g, target_block_bytes // max(1, row_bytes)))
    if bg < dim_g:
        bg = max(align, (bg // align) * align)

    # Prefer an even number of grid steps so both TensorCores on dual-core
    # parts (v7x) get balanced work under dimension_semantics=("parallel",).
    nsteps = -(-dim_g // bg)
    if nsteps > 1 and nsteps % 2 == 1:
        bg2 = -(-dim_g // (nsteps + 1))
        bg2 = -(-bg2 // align) * align
        if 0 < bg2 < dim_g:
            bg = bg2
    grid = (-(-dim_g // bg),)

    def index_map(i):
        return tuple(i if d == g else 0 for d in range(ndim))

    def blk(shape):
        return tuple(bg if d == g else shape[d] for d in range(ndim))

    return pl.pallas_call(
        kernel,
        out_shape=tuple(out_shapes),
        grid=grid,
        in_specs=[pl.BlockSpec(blk(x.shape), index_map)],
        out_specs=tuple(pl.BlockSpec(blk(s.shape), index_map) for s in out_shapes),
        compiler_params=pltpu.CompilerParams(
            dimension_semantics=("parallel",),   # shard across v7x's 2 TCs
            vmem_limit_bytes=vmem_limit,
        ),
        cost_estimate=cost,
    )(x)


def pallas_split(x, split_size, axis, *, target_block_bytes=None):
    """Equivalent of torch.split(x, split_size, axis) -> tuple of arrays."""
    ndim = x.ndim
    axis = axis % ndim
    boundaries = _chunk_layout(x.shape[axis], split_size)

    out_shapes = []
    for _, sz in boundaries:
        shp = list(x.shape)
        shp[axis] = sz
        out_shapes.append(jax.ShapeDtypeStruct(tuple(shp), x.dtype))
    n_out = len(out_shapes)

    nbytes = int(x.size) * jnp.dtype(x.dtype).itemsize
    cost = pl.CostEstimate(flops=0, transcendentals=0, bytes_accessed=2 * nbytes)

    # Generation-aware sizing: 128 MiB-VMEM parts (v5e/v6e) get larger blocks
    # and a 64 MiB scoped limit; 64 MiB-VMEM parts (v7x) get 6 MiB / 32 MiB.
    if _vmem_capacity_bytes() >= 128 * _MIB:
        vmem_limit, default_block = 64 * _MIB, 12 * _MIB
    else:
        vmem_limit, default_block = 32 * _MIB, 6 * _MIB
    if target_block_bytes is None:
        target_block_bytes = default_block

    if axis < ndim - 2:
        # Minimum-work path: per-chunk HBM->HBM DMA, no VMEM round-trip.
        kernel = _make_dma_split_kernel(axis, boundaries, ndim, n_out)
        return pl.pallas_call(
            kernel,
            out_shape=tuple(out_shapes),
            in_specs=[pl.BlockSpec(memory_space=pl.ANY)],
            out_specs=tuple(pl.BlockSpec(memory_space=pl.ANY) for _ in out_shapes),
            scratch_shapes=[pltpu.SemaphoreType.DMA((n_out,))],
            cost_estimate=cost,
        )(x)

    # Split axis is one of the last two dims: tiled, software-pipelined
    # VMEM copy (handles sub-128 lane / sub-8 sublane chunk widths).
    kernel = _make_copy_split_kernel(axis, boundaries, ndim)
    return _split_grid_path(x, axis, out_shapes, kernel, vmem_limit,
                            target_block_bytes, cost)


if __name__ == "__main__":
    key = jax.random.PRNGKey(0)
    # Small NCHW-ish input consistent with the module's generic forward.
    x = jax.random.normal(key, (2, 4, 16, 16), dtype=jnp.float32)

    # Case 1: split the last spatial axis into chunks of 8 (grid copy path).
    outs = pallas_split(x, split_size=8, axis=-1)
    outs = jax.block_until_ready(outs)
    refs = [x[..., s:s + 8] for s in range(0, 16, 8)]
    assert len(outs) == len(refs)
    for o, r in zip(outs, refs):
        assert o.shape == r.shape and o.dtype == r.dtype
        assert jnp.allclose(o, r)

    # Case 2: uneven split along the channel axis (4 -> [3, 1]) (DMA path).
    outs2 = pallas_split(x, split_size=3, axis=1)
    outs2 = jax.block_until_ready(outs2)
    refs2 = [x[:, 0:3], x[:, 3:4]]
    assert len(outs2) == len(refs2)
    for o, r in zip(outs2, refs2):
        assert o.shape == r.shape and o.dtype == r.dtype
        assert jnp.allclose(o, r)

    print("KERNEL_OK")
</pallas_src>

<mosaic_0001>
module attributes {stable_mosaic.version = 11 : i64} {
  func.func @kernel(%arg0: i32, %arg1: memref<2x4x16x16xf32, #tpu.memory_space<vmem>>, %arg2: memref<2x4x16x8xf32, #tpu.memory_space<vmem>>, %arg3: memref<2x4x16x8xf32, #tpu.memory_space<vmem>>) attributes {dimension_semantics = [#tpu.dimension_semantics<parallel>], iteration_bounds = array<i64: 1>, scalar_prefetch = 0 : i64, scratch_operands = 0 : i64, tpu.core_type = #tpu.core_type<tc>, window_params = [{transform_indices = @transform_0, window_bounds = array<i64: 2, 4, 16, 16>}, {transform_indices = @transform_1, window_bounds = array<i64: 2, 4, 16, 8>}, {transform_indices = @transform_2, window_bounds = array<i64: 2, 4, 16, 8>}]} {
    %c0 = arith.constant 0 : index
    %c0_0 = arith.constant 0 : index
    %c0_1 = arith.constant 0 : index
    %c0_2 = arith.constant 0 : index
    %0 = vector.load %arg1[%c0, %c0_0, %c0_1, %c0_2] : memref<2x4x16x16xf32, #tpu.memory_space<vmem>>, vector<2x4x16x8xf32>
    %c0_3 = arith.constant 0 : index
    %c0_4 = arith.constant 0 : index
    %c0_5 = arith.constant 0 : index
    %c0_6 = arith.constant 0 : index
    %1 = vector.load %arg2[%c0_3, %c0_4, %c0_5, %c0_6] : memref<2x4x16x8xf32, #tpu.memory_space<vmem>>, vector<2x4x16x8xf32>
    tpu.vector_store %arg2[%c0_3, %c0_4, %c0_5, %c0_6], %0 {strides = array<i32>} : memref<2x4x16x8xf32, #tpu.memory_space<vmem>>, vector<2x4x16x8xf32>,
    %c0_7 = arith.constant 0 : index
    %c0_8 = arith.constant 0 : index
    %c0_9 = arith.constant 0 : index
    %c8 = arith.constant 8 : index
    %2 = vector.load %arg1[%c0_7, %c0_8, %c0_9, %c8] : memref<2x4x16x16xf32, #tpu.memory_space<vmem>>, vector<2x4x16x8xf32>
    %c0_10 = arith.constant 0 : index
    %c0_11 = arith.constant 0 : index
    %c0_12 = arith.constant 0 : index
    %c0_13 = arith.constant 0 : index
    %3 = vector.load %arg3[%c0_10, %c0_11, %c0_12, %c0_13] : memref<2x4x16x8xf32, #tpu.memory_space<vmem>>, vector<2x4x16x8xf32>
    tpu.vector_store %arg3[%c0_10, %c0_11, %c0_12, %c0_13], %2 {strides = array<i32>} : memref<2x4x16x8xf32, #tpu.memory_space<vmem>>, vector<2x4x16x8xf32>,
    return
  }
  func.func @transform_0(%arg0: i32) -> (i32, i32, i32, i32) {
    %c0_i32 = arith.constant 0 : i32
    %c0_i32_0 = arith.constant 0 : i32
    %c0_i32_1 = arith.constant 0 : i32
    %c0_i32_2 = arith.constant 0 : i32
    return %c0_i32, %c0_i32_0, %arg0, %c0_i32_1 : i32, i32, i32, i32
  }
  func.func @transform_1(%arg0: i32) -> (i32, i32, i32, i32) {
    %c0_i32 = arith.constant 0 : i32
    %c0_i32_0 = arith.constant 0 : i32
    %c0_i32_1 = arith.constant 0 : i32
    %c0_i32_2 = arith.constant 0 : i32
    return %c0_i32, %c0_i32_0, %arg0, %c0_i32_1 : i32, i32, i32, i32
  }
  func.func @transform_2(%arg0: i32) -> (i32, i32, i32, i32) {
    %c0_i32 = arith.constant 0 : i32
    %c0_i32_0 = arith.constant 0 : i32
    %c0_i32_1 = arith.constant 0 : i32
    %c0_i32_2 = arith.constant 0 : i32
    return %c0_i32, %c0_i32_0, %arg0, %c0_i32_1 : i32, i32, i32, i32
  }
}

</mosaic_0001>

<bundles_post_ra>
// kernel: tpu_custom_call.1
= control target key start
LH: loop header
LB: loop body
LE: loop exit
PB: predicated region body
PF: predicated region fallthrough
CT: control target
= control target key end

     0   :  { %8 = vsyncpa [#allocation3], 0  ;;  %s190_s9 = smov [#allocation2]   ;;  %s365_s0 = inlined_call_operand.hbm [shape: f32[2,4,16,16], index: 0, kind: input, shape index: {}]   ;;  %s366_s1 = inlined_call_operand.vmem [shape: f32[2,4,16,8], index: 1, kind: output, shape index: {0}]   ;;  %s367_s2 = inlined_call_operand.vmem [shape: f32[2,4,16,8], index: 2, kind: output, shape index: {1}]  }
   0x1   :  { %s14_s10 = sshll.u32 %s190_s9, 4  ;;  %s166_s13 = scalar_lea.hbm %s365_s0, 2048  ;;  %s15_s10 = int_to_ptr.vmem [resolvable:$true] %s14_s10 }
   0x2   :  { %p167_p0 = scmp.ne.s32.totalorder %s365_s0, %s166_s13  ;;  %p170_p1 = scmp.lt.u32.totalorder %s166_s13, %s365_s0 }
   0x4   :  { %p172_p2 = pnand %p170_p1, %p167_p0 }
   0x6   :  { %175 = shalt.err (!%p172_p2)
}
   0x7   :  { %s176_s18 = scalar_lea.vmem %s15_s10, 2048  ;;  %p181_p4 = scmp.lt.s32.totalorder %s15_s10, %s15_s10 }
   0x8   :  { %p177_p3 = scmp.ne.s32.totalorder %s15_s10, %s176_s18  ;;  %p182_p5 = scmp.lt.s32.totalorder %s176_s18, %s176_s18 }
   0xa   :  { %p183_p6 = por %p182_p5, %p181_p4 }
   0xc   :  { %p184_p7 = pnand %p183_p6, %p177_p3 }
   0xe   :  { %187 = shalt.err (!%p184_p7)
}
   0xf   :  { %s191_s19 = smov 128   ;;  %s192_s20 = smov 8  }
  0x10   :  { %20 = dma.hbm_to_vmem [thread:$0]  %s365_s0, 2048, %s15_s10, [#allocation3], %s191_s19, %s191_s19, %s192_s20  }
  0x11   :  { %188 = dma.done.wait [#allocation3], 2048  }
  0x12   :  { %189 = vsyncadd [#allocation3], 4294965248  ;;  %v59_v0 = vld [vmem:[#allocation2 + $0x10] sm:$0xff]  ;;  %v57_v1 = vld [vmem:[#allocation2] sm:$0xff]  ;;  %vm40_vm0 = vcmask 64512   ;;  %s193_s23 = smov 120  }
  0x13   :  { %v60_v2 = vld [vmem:[#allocation2 + $0x18] sm:$0xff]  ;;  %93 = vrot.lane.b32.xlu1 %v59_v0, %s193_s23  ;;  %89 = vrot.lane.b32.xlu0 %v57_v1, %s193_s23  ;;  %v58_v3 = vld [vmem:[#allocation2 + $0x8] sm:$0xff]  ;;  %v61_v5 = vld [vmem:[#allocation2 + $0x20] sm:$0xff]  ;;  %41 = vst.msk [vmem:[%s366_s1] sm:$0xff] %vm40_vm0, %v57_v1 }
  0x14   :  { %v62_v4 = vld [vmem:[#allocation2 + $0x28] sm:$0xff]  ;;  %43 = vst.msk [vmem:[%s366_s1 + $0x10] sm:$0xff] %vm40_vm0, %v59_v0  ;;  %44 = vst.msk [vmem:[%s366_s1 + $0x18] sm:$0xff] %vm40_vm0, %v60_v2  ;;  %v64_v6 = vld [vmem:[#allocation2 + $0x38] sm:$0xff] }
  0x15   :  { %v63_v7 = vld [vmem:[#allocation2 + $0x30] sm:$0xff]  ;;  %v66_v8 = vld [vmem:[#allocation2 + $0x48] sm:$0xff]  ;;  %42 = vst.msk [vmem:[%s366_s1 + $0x8] sm:$0xff] %vm40_vm0, %v58_v3  ;;  %45 = vst.msk [vmem:[%s366_s1 + $0x20] sm:$0xff] %vm40_vm0, %v61_v5 }
  0x16   :  { %46 = vst.msk [vmem:[%s366_s1 + $0x28] sm:$0xff] %vm40_vm0, %v62_v4  ;;  %v65_v9 = vld [vmem:[#allocation2 + $0x40] sm:$0xff]  ;;  %v68_v10 = vld [vmem:[#allocation2 + $0x58] sm:$0xff]  ;;  %v67_v11 = vld [vmem:[#allocation2 + $0x50] sm:$0xff] }
  0x17   :  { %47 = vst.msk [vmem:[%s366_s1 + $0x30] sm:$0xff] %vm40_vm0, %v63_v7  ;;  %48 = vst.msk [vmem:[%s366_s1 + $0x38] sm:$0xff] %vm40_vm0, %v64_v6  ;;  %v70_v12 = vld [vmem:[#allocation2 + $0x68] sm:$0xff]  ;;  %v69_v13 = vld [vmem:[#allocation2 + $0x60] sm:$0xff]  ;;  %95 = vrot.lane.b32.xlu1 %v60_v2, %s193_s23  ;;  %91 = vrot.lane.b32.xlu0 %v58_v3, %s193_s23 }
  0x18   :  { %50 = vst.msk [vmem:[%s366_s1 + $0x48] sm:$0xff] %vm40_vm0, %v66_v8  ;;  %v72_v14 = vld [vmem:[#allocation2 + $0x78] sm:$0xff]  ;;  %49 = vst.msk [vmem:[%s366_s1 + $0x40] sm:$0xff] %vm40_vm0, %v65_v9  ;;  %v71_v15 = vld [vmem:[#allocation2 + $0x70] sm:$0xff] }
  0x19   :  { %51 = vst.msk [vmem:[%s366_s1 + $0x50] sm:$0xff] %vm40_vm0, %v67_v11  ;;  %52 = vst.msk [vmem:[%s366_s1 + $0x58] sm:$0xff] %vm40_vm0, %v68_v10 }
  0x1a   :  { %53 = vst.msk [vmem:[%s366_s1 + $0x60] sm:$0xff] %vm40_vm0, %v69_v13  ;;  %54 = vst.msk [vmem:[%s366_s1 + $0x68] sm:$0xff] %vm40_vm0, %v70_v12 }
  0x1b   :  { %56 = vst.msk [vmem:[%s366_s1 + $0x78] sm:$0xff] %vm40_vm0, %v72_v14  ;;  %55 = vst.msk [vmem:[%s366_s1 + $0x70] sm:$0xff] %vm40_vm0, %v71_v15  ;;  %99 = vrot.lane.b32.xlu1 %v62_v4, %s193_s23  ;;  %97 = vrot.lane.b32.xlu0 %v61_v5, %s193_s23 }
  0x1f   :  { %103 = vrot.lane.b32.xlu1 %v64_v6, %s193_s23  ;;  %101 = vrot.lane.b32.xlu0 %v63_v7, %s193_s23 }
  0x23   :  { %107 = vrot.lane.b32.xlu1 %v66_v8, %s193_s23  ;;  %105 = vrot.lane.b32.xlu0 %v65_v9, %s193_s23 }
  0x27   :  { %111 = vrot.lane.b32.xlu1 %v68_v10, %s193_s23  ;;  %109 = vrot.lane.b32.xlu0 %v67_v11, %s193_s23 }
  0x2b   :  { %115 = vrot.lane.b32.xlu1 %v70_v12, %s193_s23  ;;  %113 = vrot.lane.b32.xlu0 %v69_v13, %s193_s23 }
  0x2f   :  { %119 = vrot.lane.b32.xlu1 %v72_v14, %s193_s23  ;;  %117 = vrot.lane.b32.xlu0 %v71_v15, %s193_s23 }
  0x85   :  { %v94_v16 = vpop.permute.xlu1 %93  ;;  %v90_v17 = vpop.permute.xlu0 %89 }
  0x86   :  { %139 = vst.msk [vmem:[%s367_s2 + $0x10] sm:$0xff] %vm40_vm0, %v94_v16  ;;  %137 = vst.msk [vmem:[%s367_s2] sm:$0xff] %vm40_vm0, %v90_v17 }
  0x89   :  { %v96_v18 = vpop.permute.xlu1 %95  ;;  %v92_v19 = vpop.permute.xlu0 %91 }
  0x8a   :  { %140 = vst.msk [vmem:[%s367_s2 + $0x18] sm:$0xff] %vm40_vm0, %v96_v18  ;;  %138 = vst.msk [vmem:[%s367_s2 + $0x8] sm:$0xff] %vm40_vm0, %v92_v19 }
  0x8d   :  { %v100_v20 = vpop.permute.xlu1 %99  ;;  %v98_v21 = vpop.permute.xlu0 %97 }
  0x8e   :  { %142 = vst.msk [vmem:[%s367_s2 + $0x28] sm:$0xff] %vm40_vm0, %v100_v20  ;;  %141 = vst.msk [vmem:[%s367_s2 + $0x20] sm:$0xff] %vm40_vm0, %v98_v21 }
  0x91   :  { %v104_v22 = vpop.permute.xlu1 %103  ;;  %v102_v23 = vpop.permute.xlu0 %101 }
  0x92   :  { %144 = vst.msk [vmem:[%s367_s2 + $0x38] sm:$0xff] %vm40_vm0, %v104_v22  ;;  %143 = vst.msk [vmem:[%s367_s2 + $0x30] sm:$0xff] %vm40_vm0, %v102_v23 }
  0x95   :  { %v108_v24 = vpop.permute.xlu1 %107  ;;  %v106_v25 = vpop.permute.xlu0 %105 }
  0x96   :  { %146 = vst.msk [vmem:[%s367_s2 + $0x48] sm:$0xff] %vm40_vm0, %v108_v24  ;;  %145 = vst.msk [vmem:[%s367_s2 + $0x40] sm:$0xff] %vm40_vm0, %v106_v25 }
  0x99   :  { %v112_v26 = vpop.permute.xlu1 %111  ;;  %v110_v27 = vpop.permute.xlu0 %109 }
  0x9a   :  { %148 = vst.msk [vmem:[%s367_s2 + $0x58] sm:$0xff] %vm40_vm0, %v112_v26  ;;  %147 = vst.msk [vmem:[%s367_s2 + $0x50] sm:$0xff] %vm40_vm0, %v110_v27 }
  0x9d   :  { %v116_v28 = vpop.permute.xlu1 %115  ;;  %v114_v29 = vpop.permute.xlu0 %113 }
  0x9e   :  { %150 = vst.msk [vmem:[%s367_s2 + $0x68] sm:$0xff] %vm40_vm0, %v116_v28  ;;  %149 = vst.msk [vmem:[%s367_s2 + $0x60] sm:$0xff] %vm40_vm0, %v114_v29 }
  0xa1   :  { %v120_v30 = vpop.permute.xlu1 %119  ;;  %v118_v31 = vpop.permute.xlu0 %117 }
  0xa2   :  { %152 = vst.msk [vmem:[%s367_s2 + $0x78] sm:$0xff] %vm40_vm0, %v120_v30  ;;  %151 = vst.msk [vmem:[%s367_s2 + $0x70] sm:$0xff] %vm40_vm0, %v118_v31 }
  0xa3   :  { %161 = vsyncpa [#allocation3], 1 }

</bundles_post_ra>
